<compile_context>
chip_gen: v7x
topology: tpu7x:2x2x1
jax: 0.10.0
libtpu: 0.0.40
codegen_flags: <defaults>
</compile_context>

<pallas_src>
import jax
import jax.numpy as jnp
from jax.experimental import pallas as pl
from jax.experimental.pallas import tpu as pltpu


def _elu(x):
    # nn.ELU with alpha=1.0 (exp arg clamped so the dead branch never overflows).
    return jnp.where(x > 0, x, jnp.exp(jnp.minimum(x, 0.0)) - 1.0)


def dce_net_kernel(x_ref, hct_ref,
                   w0_ref, b0_ref, w1_ref, b1_ref,
                   we1h_ref, we1c_ref, be1_ref,
                   we2_ref, be2_ref,
                   blo_ref, bdiff_ref,
                   out_ref):
    x = x_ref[...]              # [bt, T]   f32 or bf16, natural HBM layout
    hct0 = hct_ref[...]         # [1,  bt]  f32
    mm_dtype = w0_ref.dtype     # matmul-operand dtype (f32 or bf16)

    # self.linear : Linear(T,H0)+ELU, Linear(H0,H1)+ELU.
    # First layer contracts T-with-T so batch lands on lanes.  OOB rows of a
    # partial last block flow through as garbage and are masked on store.
    h = jnp.einsum('ot,bt->ob', w0_ref[...], x,
                   preferred_element_type=jnp.float32)                      # [H0, bt]
    h = _elu(h + b0_ref[...])
    h = _elu(jnp.dot(w1_ref[...], h.astype(mm_dtype),
                     preferred_element_type=jnp.float32) + b1_ref[...])     # [H1, bt]

    # self.encoder : Linear(H1+1, HE)+ELU, Linear(HE, 4).
    # cat((h, Hct[:,0:1]), 1) @ we1  ==  we1h^T @ h  +  we1c (outer) hct0
    # -> the Hct column is a rank-1 VPU broadcast, not a K=1 MXU matmul.
    e = _elu(jnp.dot(we1h_ref[...], h.astype(mm_dtype),
                     preferred_element_type=jnp.float32)
             + we1c_ref[...] * hct0
             + be1_ref[...])                                                # [HE, bt]
    p = jnp.dot(we2_ref[...], e.astype(mm_dtype),
                preferred_element_type=jnp.float32) + be2_ref[...]          # [4,  bt]

    # bounds[0, j] + sigmoid(p[j, :]) * (bounds[1, j] - bounds[0, j])
    out_ref[...] = blo_ref[...] + jax.nn.sigmoid(p) * bdiff_ref[...]


def _round_up(x, m):
    return ((x + m - 1) // m) * m


def dce_net_forward(X, Hct, weights, bounds, *, b_tile=8192, use_bf16=False):
    """Pallas forward.  Returns (ke, dt, ve, vp), each of shape [B, 1] float32."""
    B, T = X.shape
    (w0, b0, w1, b1, we1h, we1c, be1, we2, be2) = weights

    # Lane-dense tile (multiple of 128).  Cap at ceil(B/2) so the "parallel"
    # grid has >= 2 steps whenever B > 128 (keeps both v7x TensorCores busy);
    # the large default amortizes the ~0.35 us per-grid-step overhead.
    half_b = _round_up(-(-B // 2), 128) if B > 0 else 128
    b_tile = max(128, _round_up(min(b_tile, half_b), 128))
    n_tiles = pl.cdiv(B, b_tile)

    # Matmul operands as [out, in]; only these (and X) go bf16 when requested.
    mm_dtype = jnp.bfloat16 if use_bf16 else X.dtype
    Xin = X.astype(mm_dtype)                        # no transpose / pad of X
    w0t = w0.T.astype(mm_dtype)                     # [H0, T]
    w1t = w1.T.astype(mm_dtype)                     # [H1, H0]
    we1ht = we1h.T.astype(mm_dtype)                 # [HE, H1]
    we2t = we2.T.astype(mm_dtype)                   # [4,  HE]
    # Biases / bounds / rank-1 Hct weight stay f32 (activation math is f32,
    # which is also the right choice for v5e's no-bf16 VPU/EUP).
    b0c, b1c = b0.T, b1.T                           # [H0,1], [H1,1]
    we1cc, be1c, be2c = we1c.T, be1.T, be2.T        # [HE,1], [HE,1], [4,1]
    blo_c = bounds[0:1, :].T                        # [4,1]
    bdiff_c = (bounds[1:2, :] - bounds[0:1, :]).T   # [4,1]
    hct0 = Hct[:, 0][None, :].astype(jnp.float32)   # [1, B]  (tiny)

    args = (Xin, hct0,
            w0t, b0c, w1t, b1c,
            we1ht, we1cc, be1c,
            we2t, be2c,
            blo_c, bdiff_c)

    def resident(a):
        # Weights / biases / bounds stay resident in VMEM across all tiles.
        return pl.BlockSpec(a.shape, lambda i: (0, 0))

    in_specs = ([pl.BlockSpec((b_tile, T), lambda i: (i, 0)),   # X tile (sublane-tiled)
                 pl.BlockSpec((1, b_tile), lambda i: (0, i))]   # Hct tile (lane-tiled)
                + [resident(a) for a in args[2:]])

    params_t = pl.pallas_call(
        dce_net_kernel,
        out_shape=jax.ShapeDtypeStruct((4, B), jnp.float32),
        grid_spec=pltpu.PrefetchScalarGridSpec(
            num_scalar_prefetch=0,
            grid=(n_tiles,),
            in_specs=in_specs,
            out_specs=pl.BlockSpec((4, b_tile), lambda i: (0, i)),
        ),
        compiler_params=pltpu.CompilerParams(
            dimension_semantics=("parallel",),        # megacore sharding on v7x
            vmem_limit_bytes=64 * 1024 * 1024),       # headroom for big tiles (v5e default is 16 MiB)
    )(*args)

    # rows: 0=ke, 1=ve, 2=vp, 3=dt   (matches params[:, j] in the PyTorch code)
    ke = params_t[0, :][:, None]
    ve = params_t[1, :][:, None]
    vp = params_t[2, :][:, None]
    dt = params_t[3, :][:, None]
    return ke, dt, ve, vp


def reference_forward(X, Hct, weights, bounds):
    """Pure-JAX reference mirroring the PyTorch 'linear' forward."""
    (w0, b0, w1, b1, we1h, we1c, be1, we2, be2) = weights
    h = _elu(X @ w0 + b0)
    h = _elu(h @ w1 + b1)
    cat = jnp.concatenate([h, Hct[:, 0:1]], axis=1)
    we1 = jnp.concatenate([we1h, we1c], axis=0)
    e = _elu(cat @ we1 + be1)
    p = e @ we2 + be2
    out = bounds[0:1, :] + jax.nn.sigmoid(p) * (bounds[1:2, :] - bounds[0:1, :])
    return out[:, 0:1], out[:, 3:4], out[:, 1:2], out[:, 2:3]  # ke, dt, ve, vp


def build_aif_and_timing(Hct, B, T):
    """Glue matching the aif / acquisition_timing construction in forward()."""
    aif_c = dict(t0=0.1, tr=0.2, ab=5.0, mb=22.0, ae=1.0,
                 me=0.1, ar=0.05, mm=0.2, mr=10.0)
    aif = jnp.zeros((9, B), jnp.float32)
    aif = aif.at[0].set(aif_c['t0'])
    aif = aif.at[1].set(aif_c['tr'])
    aif = aif.at[2].set(aif_c['ab'] / (1.0 - Hct[:, 0]))
    aif = aif.at[3].set(aif_c['mb'])
    aif = aif.at[4].set(aif_c['ae'])
    aif = aif.at[5].set(aif_c['me'])
    aif = aif.at[6].set(aif_c['ar'])
    aif = aif.at[7].set(aif_c['mm'])
    aif = aif.at[8].set(aif_c['mr'])
    timing = jnp.arange(T, dtype=jnp.float32) * 0.05               # [T]
    timing = jnp.tile(timing[None, :], (B, 1))                     # [B, T]
    col = jnp.arange(T)[None, :]
    lens = Hct[:, 1].astype(jnp.int32)[:, None]
    timing = jnp.where(col < lens, timing, 0.0)
    return aif, timing


def _make_inputs(key, B, T, H0, H1, HE):
    ks = jax.random.split(key, 12)
    sc = 0.1
    X = jax.random.normal(ks[0], (B, T), jnp.float32)
    hct_val = 0.3 + 0.2 * jax.random.uniform(ks[1], (B,), jnp.float32)
    hct_len = jax.random.randint(ks[2], (B,), 4, T + 1).astype(jnp.float32)
    Hct = jnp.stack([hct_val, hct_len], axis=1)                    # [B, 2]
    weights = (
        sc * jax.random.normal(ks[3], (T, H0), jnp.float32),       # w0
        sc * jax.random.normal(ks[4], (1, H0), jnp.float32),       # b0
        sc * jax.random.normal(ks[5], (H0, H1), jnp.float32),      # w1
        sc * jax.random.normal(ks[6], (1, H1), jnp.float32),       # b1
        sc * jax.random.normal(ks[7], (H1, HE), jnp.float32),      # we1 (hidden part)
        sc * jax.random.normal(ks[8], (1, HE), jnp.float32),       # we1 (Hct column)
        sc * jax.random.normal(ks[9], (1, HE), jnp.float32),       # be1
        sc * jax.random.normal(ks[10], (HE, 4), jnp.float32),      # we2
        sc * jax.random.normal(ks[11], (1, 4), jnp.float32),       # be2
    )
    return X, Hct, weights


if __name__ == "__main__":
    T = 16           # hp.max_rep (signal length)
    H0, H1 = 32, 32  # hp.network.layers
    HE = (H1 + 1) // 2

    # hp.simulations.bounds: rows = [lower, upper], cols = [ke, ve, vp, dt]
    bounds = jnp.array([[0.0, 0.0, 0.0, -0.5],
                        [3.0, 1.0, 0.2,  0.5]], jnp.float32)

    key = jax.random.PRNGKey(0)

    # --- case 1: small batch (single partial tile, exercises masked OOB lanes) ---
    B = 8
    X, Hct, weights = _make_inputs(key, B, T, H0, H1, HE)
    fwd = jax.jit(lambda x, h: dce_net_forward(x, h, weights, bounds))
    ke, dt, ve, vp = fwd(X, Hct)
    jax.block_until_ready((ke, dt, ve, vp))
    ref = reference_forward(X, Hct, weights, bounds)
    for a, b in zip((ke, dt, ve, vp), ref):
        assert a.shape == b.shape
        assert jnp.allclose(a, b, atol=1e-4, rtol=1e-4), "mismatch vs reference (B=8)"

    # --- case 2: multi-tile batch (>= 2 grid steps + partial last block) ---
    B2 = 200
    X2, Hct2, weights2 = _make_inputs(jax.random.PRNGKey(1), B2, T, H0, H1, HE)
    fwd2 = jax.jit(lambda x, h: dce_net_forward(x, h, weights2, bounds))
    out2 = fwd2(X2, Hct2)
    jax.block_until_ready(out2)
    ref2 = reference_forward(X2, Hct2, weights2, bounds)
    for a, b in zip(out2, ref2):
        assert jnp.allclose(a, b, atol=1e-4, rtol=1e-4), "mismatch vs reference (B=200)"

    # --- case 3: bf16 MXU path (X + matmul weights bf16, activations f32) ---
    out3 = jax.jit(lambda x, h: dce_net_forward(
        x, h, weights2, bounds, use_bf16=True))(X2, Hct2)
    jax.block_until_ready(out3)
    for a, b in zip(out3, ref2):
        assert jnp.allclose(a, b, atol=5e-2, rtol=5e-2), "mismatch vs reference (bf16)"

    # Remaining model.forward glue (outside the network hot path).
    aif, acq_timing = build_aif_and_timing(Hct, B, T)
    jax.block_until_ready((aif, acq_timing))
    # TODO(synk): X_dw = Cosine8AIF_ExtKety_deep_aif(acq_timing, aif, ke, dt, ve, vp)
    # is defined in an external `functions` module and is not part of model.py.

    print("KERNEL_OK")
</pallas_src>

<mosaic_0001>
module attributes {stable_mosaic.version = 11 : i64} {
  func.func @dce_net_kernel(%arg0: i32, %arg1: memref<128x16xf32, #tpu.memory_space<vmem>>, %arg2: memref<1x128xf32, #tpu.memory_space<vmem>>, %arg3: memref<32x16xf32, #tpu.memory_space<vmem>>, %arg4: memref<32x1xf32, #tpu.memory_space<vmem>>, %arg5: memref<32x32xf32, #tpu.memory_space<vmem>>, %arg6: memref<32x1xf32, #tpu.memory_space<vmem>>, %arg7: memref<16x32xf32, #tpu.memory_space<vmem>>, %arg8: memref<16x1xf32, #tpu.memory_space<vmem>>, %arg9: memref<16x1xf32, #tpu.memory_space<vmem>>, %arg10: memref<4x16xf32, #tpu.memory_space<vmem>>, %arg11: memref<4x1xf32, #tpu.memory_space<vmem>>, %arg12: memref<4x1xf32, #tpu.memory_space<vmem>>, %arg13: memref<4x1xf32, #tpu.memory_space<vmem>>, %arg14: memref<4x128xf32, #tpu.memory_space<vmem>>) attributes {dimension_semantics = [#tpu.dimension_semantics<parallel>], iteration_bounds = array<i64: 1>, scalar_prefetch = 0 : i64, scratch_operands = 0 : i64, tpu.core_type = #tpu.core_type<tc>, window_params = [{transform_indices = @transform_0, window_bounds = array<i64: 128, 16>}, {transform_indices = @transform_1, window_bounds = array<i64: 1, 128>}, {pipeline_mode = #tpu.pipeline_mode<synchronous>, transform_indices = @transform_2, window_bounds = array<i64: 32, 16>}, {pipeline_mode = #tpu.pipeline_mode<synchronous>, transform_indices = @transform_3, window_bounds = array<i64: 32, 1>}, {pipeline_mode = #tpu.pipeline_mode<synchronous>, transform_indices = @transform_4, window_bounds = array<i64: 32, 32>}, {pipeline_mode = #tpu.pipeline_mode<synchronous>, transform_indices = @transform_5, window_bounds = array<i64: 32, 1>}, {pipeline_mode = #tpu.pipeline_mode<synchronous>, transform_indices = @transform_6, window_bounds = array<i64: 16, 32>}, {pipeline_mode = #tpu.pipeline_mode<synchronous>, transform_indices = @transform_7, window_bounds = array<i64: 16, 1>}, {pipeline_mode = #tpu.pipeline_mode<synchronous>, transform_indices = @transform_8, window_bounds = array<i64: 16, 1>}, {pipeline_mode = #tpu.pipeline_mode<synchronous>, transform_indices = @transform_9, window_bounds = array<i64: 4, 16>}, {pipeline_mode = #tpu.pipeline_mode<synchronous>, transform_indices = @transform_10, window_bounds = array<i64: 4, 1>}, {pipeline_mode = #tpu.pipeline_mode<synchronous>, transform_indices = @transform_11, window_bounds = array<i64: 4, 1>}, {pipeline_mode = #tpu.pipeline_mode<synchronous>, transform_indices = @transform_12, window_bounds = array<i64: 4, 1>}, {transform_indices = @transform_13, window_bounds = array<i64: 4, 128>}]} {
    %c0 = arith.constant 0 : index
    %c0_0 = arith.constant 0 : index
    %0 = vector.load %arg1[%c0, %c0_0] : memref<128x16xf32, #tpu.memory_space<vmem>>, vector<128x16xf32>
    %c0_1 = arith.constant 0 : index
    %c0_2 = arith.constant 0 : index
    %1 = vector.load %arg2[%c0_1, %c0_2] : memref<1x128xf32, #tpu.memory_space<vmem>>, vector<1x128xf32>
    %c0_3 = arith.constant 0 : index
    %c0_4 = arith.constant 0 : index
    %2 = vector.load %arg3[%c0_3, %c0_4] : memref<32x16xf32, #tpu.memory_space<vmem>>, vector<32x16xf32>
    "tpu.trace_start"() <{level = 10 : i32, message = "ot,bt->ob"}> : () -> ()
    %cst = arith.constant dense<0.000000e+00> : vector<32x128xf32>
    %3 = tpu.matmul %2, %0, %cst {dimension_numbers = #tpu.dot_dimension_numbers<[1], [1], [0], [0], [0, 0, 1, 0], [], []>} : vector<32x16xf32>, vector<128x16xf32>, vector<32x128xf32> -> vector<32x128xf32>
    "tpu.trace_stop"() : () -> ()
    %c0_5 = arith.constant 0 : index
    %c0_6 = arith.constant 0 : index
    %4 = vector.load %arg4[%c0_5, %c0_6] : memref<32x1xf32, #tpu.memory_space<vmem>>, vector<32x1xf32>
    %5 = vector.broadcast %4 : vector<32x1xf32> to vector<32x128xf32>
    %6 = arith.addf %3, %5 : vector<32x128xf32>
    %cst_7 = arith.constant 0.000000e+00 : f32
    %7 = vector.broadcast %cst_7 : f32 to vector<32x128xf32>
    %8 = arith.cmpf ogt, %6, %7 : vector<32x128xf32>
    %cst_8 = arith.constant 0.000000e+00 : f32
    %9 = vector.broadcast %cst_8 : f32 to vector<32x128xf32>
    %10 = arith.minimumf %6, %9 : vector<32x128xf32>
    %11 = math.exp %10 : vector<32x128xf32>
    %cst_9 = arith.constant 1.000000e+00 : f32
    %12 = vector.broadcast %cst_9 : f32 to vector<32x128xf32>
    %13 = arith.subf %11, %12 : vector<32x128xf32>
    %14 = arith.select %8, %6, %13 : vector<32x128xi1>, vector<32x128xf32>
    %c0_10 = arith.constant 0 : index
    %c0_11 = arith.constant 0 : index
    %15 = vector.load %arg5[%c0_10, %c0_11] : memref<32x32xf32, #tpu.memory_space<vmem>>, vector<32x32xf32>
    %cst_12 = arith.constant dense<0.000000e+00> : vector<32x128xf32>
    %16 = tpu.matmul %15, %14, %cst_12 {dimension_numbers = #tpu.dot_dimension_numbers<[1], [0], [0], [1], [0, 0, 1, 1], [], []>} : vector<32x32xf32>, vector<32x128xf32>, vector<32x128xf32> -> vector<32x128xf32>
    %c0_13 = arith.constant 0 : index
    %c0_14 = arith.constant 0 : index
    %17 = vector.load %arg6[%c0_13, %c0_14] : memref<32x1xf32, #tpu.memory_space<vmem>>, vector<32x1xf32>
    %18 = vector.broadcast %17 : vector<32x1xf32> to vector<32x128xf32>
    %19 = arith.addf %16, %18 : vector<32x128xf32>
    %cst_15 = arith.constant 0.000000e+00 : f32
    %20 = vector.broadcast %cst_15 : f32 to vector<32x128xf32>
    %21 = arith.cmpf ogt, %19, %20 : vector<32x128xf32>
    %cst_16 = arith.constant 0.000000e+00 : f32
    %22 = vector.broadcast %cst_16 : f32 to vector<32x128xf32>
    %23 = arith.minimumf %19, %22 : vector<32x128xf32>
    %24 = math.exp %23 : vector<32x128xf32>
    %cst_17 = arith.constant 1.000000e+00 : f32
    %25 = vector.broadcast %cst_17 : f32 to vector<32x128xf32>
    %26 = arith.subf %24, %25 : vector<32x128xf32>
    %27 = arith.select %21, %19, %26 : vector<32x128xi1>, vector<32x128xf32>
    %c0_18 = arith.constant 0 : index
    %c0_19 = arith.constant 0 : index
    %28 = vector.load %arg7[%c0_18, %c0_19] : memref<16x32xf32, #tpu.memory_space<vmem>>, vector<16x32xf32>
    %cst_20 = arith.constant dense<0.000000e+00> : vector<16x128xf32>
    %29 = tpu.matmul %28, %27, %cst_20 {dimension_numbers = #tpu.dot_dimension_numbers<[1], [0], [0], [1], [0, 0, 1, 1], [], []>} : vector<16x32xf32>, vector<32x128xf32>, vector<16x128xf32> -> vector<16x128xf32>
    %c0_21 = arith.constant 0 : index
    %c0_22 = arith.constant 0 : index
    %30 = vector.load %arg8[%c0_21, %c0_22] : memref<16x1xf32, #tpu.memory_space<vmem>>, vector<16x1xf32>
    %31 = vector.broadcast %30 : vector<16x1xf32> to vector<16x128xf32>
    %32 = vector.broadcast %1 : vector<1x128xf32> to vector<16x128xf32>
    %33 = arith.mulf %31, %32 : vector<16x128xf32>
    %34 = arith.addf %29, %33 : vector<16x128xf32>
    %c0_23 = arith.constant 0 : index
    %c0_24 = arith.constant 0 : index
    %35 = vector.load %arg9[%c0_23, %c0_24] : memref<16x1xf32, #tpu.memory_space<vmem>>, vector<16x1xf32>
    %36 = vector.broadcast %35 : vector<16x1xf32> to vector<16x128xf32>
    %37 = arith.addf %34, %36 : vector<16x128xf32>
    %cst_25 = arith.constant 0.000000e+00 : f32
    %38 = vector.broadcast %cst_25 : f32 to vector<16x128xf32>
    %39 = arith.cmpf ogt, %37, %38 : vector<16x128xf32>
    %cst_26 = arith.constant 0.000000e+00 : f32
    %40 = vector.broadcast %cst_26 : f32 to vector<16x128xf32>
    %41 = arith.minimumf %37, %40 : vector<16x128xf32>
    %42 = math.exp %41 : vector<16x128xf32>
    %cst_27 = arith.constant 1.000000e+00 : f32
    %43 = vector.broadcast %cst_27 : f32 to vector<16x128xf32>
    %44 = arith.subf %42, %43 : vector<16x128xf32>
    %45 = arith.select %39, %37, %44 : vector<16x128xi1>, vector<16x128xf32>
    %c0_28 = arith.constant 0 : index
    %c0_29 = arith.constant 0 : index
    %46 = vector.load %arg10[%c0_28, %c0_29] : memref<4x16xf32, #tpu.memory_space<vmem>>, vector<4x16xf32>
    %cst_30 = arith.constant dense<0.000000e+00> : vector<4x128xf32>
    %47 = tpu.matmul %46, %45, %cst_30 {dimension_numbers = #tpu.dot_dimension_numbers<[1], [0], [0], [1], [0, 0, 1, 1], [], []>} : vector<4x16xf32>, vector<16x128xf32>, vector<4x128xf32> -> vector<4x128xf32>
    %c0_31 = arith.constant 0 : index
    %c0_32 = arith.constant 0 : index
    %48 = vector.load %arg11[%c0_31, %c0_32] : memref<4x1xf32, #tpu.memory_space<vmem>>, vector<4x1xf32>
    %49 = vector.broadcast %48 : vector<4x1xf32> to vector<4x128xf32>
    %50 = arith.addf %47, %49 : vector<4x128xf32>
    %c0_33 = arith.constant 0 : index
    %c0_34 = arith.constant 0 : index
    %51 = vector.load %arg12[%c0_33, %c0_34] : memref<4x1xf32, #tpu.memory_space<vmem>>, vector<4x1xf32>
    %52 = arith.negf %50 : vector<4x128xf32>
    %53 = math.exp %52 : vector<4x128xf32>
    %cst_35 = arith.constant 1.000000e+00 : f32
    %54 = vector.broadcast %cst_35 : f32 to vector<4x128xf32>
    %55 = arith.addf %54, %53 : vector<4x128xf32>
    %56 = arith.divf %54, %55 : vector<4x128xf32>
    %c0_36 = arith.constant 0 : index
    %c0_37 = arith.constant 0 : index
    %57 = vector.load %arg13[%c0_36, %c0_37] : memref<4x1xf32, #tpu.memory_space<vmem>>, vector<4x1xf32>
    %58 = vector.broadcast %57 : vector<4x1xf32> to vector<4x128xf32>
    %59 = arith.mulf %56, %58 : vector<4x128xf32>
    %60 = vector.broadcast %51 : vector<4x1xf32> to vector<4x128xf32>
    %61 = arith.addf %60, %59 : vector<4x128xf32>
    %c0_38 = arith.constant 0 : index
    %c0_39 = arith.constant 0 : index
    %62 = vector.load %arg14[%c0_38, %c0_39] : memref<4x128xf32, #tpu.memory_space<vmem>>, vector<4x128xf32>
    tpu.vector_store %arg14[%c0_38, %c0_39], %61 {strides = array<i32>} : memref<4x128xf32, #tpu.memory_space<vmem>>, vector<4x128xf32>,
    return
  }
  func.func @transform_0(%arg0: i32) -> (i32, i32) {
    %c0_i32 = arith.constant 0 : i32
    %c0_i32_0 = arith.constant 0 : i32
    return %arg0, %c0_i32 : i32, i32
  }
  func.func @transform_1(%arg0: i32) -> (i32, i32) {
    %c0_i32 = arith.constant 0 : i32
    %c0_i32_0 = arith.constant 0 : i32
    return %c0_i32, %arg0 : i32, i32
  }
  func.func @transform_2(%arg0: i32) -> (i32, i32) {
    %c0_i32 = arith.constant 0 : i32
    %c0_i32_0 = arith.constant 0 : i32
    %c0_i32_1 = arith.constant 0 : i32
    return %c0_i32, %c0_i32_0 : i32, i32
  }
  func.func @transform_3(%arg0: i32) -> (i32, i32) {
    %c0_i32 = arith.constant 0 : i32
    %c0_i32_0 = arith.constant 0 : i32
    %c0_i32_1 = arith.constant 0 : i32
    return %c0_i32, %c0_i32_0 : i32, i32
  }
  func.func @transform_4(%arg0: i32) -> (i32, i32) {
    %c0_i32 = arith.constant 0 : i32
    %c0_i32_0 = arith.constant 0 : i32
    %c0_i32_1 = arith.constant 0 : i32
    return %c0_i32, %c0_i32_0 : i32, i32
  }
  func.func @transform_5(%arg0: i32) -> (i32, i32) {
    %c0_i32 = arith.constant 0 : i32
    %c0_i32_0 = arith.constant 0 : i32
    %c0_i32_1 = arith.constant 0 : i32
    return %c0_i32, %c0_i32_0 : i32, i32
  }
  func.func @transform_6(%arg0: i32) -> (i32, i32) {
    %c0_i32 = arith.constant 0 : i32
    %c0_i32_0 = arith.constant 0 : i32
    %c0_i32_1 = arith.constant 0 : i32
    return %c0_i32, %c0_i32_0 : i32, i32
  }
  func.func @transform_7(%arg0: i32) -> (i32, i32) {
    %c0_i32 = arith.constant 0 : i32
    %c0_i32_0 = arith.constant 0 : i32
    %c0_i32_1 = arith.constant 0 : i32
    return %c0_i32, %c0_i32_0 : i32, i32
  }
  func.func @transform_8(%arg0: i32) -> (i32, i32) {
    %c0_i32 = arith.constant 0 : i32
    %c0_i32_0 = arith.constant 0 : i32
    %c0_i32_1 = arith.constant 0 : i32
    return %c0_i32, %c0_i32_0 : i32, i32
  }
  func.func @transform_9(%arg0: i32) -> (i32, i32) {
    %c0_i32 = arith.constant 0 : i32
    %c0_i32_0 = arith.constant 0 : i32
    %c0_i32_1 = arith.constant 0 : i32
    return %c0_i32, %c0_i32_0 : i32, i32
  }
  func.func @transform_10(%arg0: i32) -> (i32, i32) {
    %c0_i32 = arith.constant 0 : i32
    %c0_i32_0 = arith.constant 0 : i32
    %c0_i32_1 = arith.constant 0 : i32
    return %c0_i32, %c0_i32_0 : i32, i32
  }
  func.func @transform_11(%arg0: i32) -> (i32, i32) {
    %c0_i32 = arith.constant 0 : i32
    %c0_i32_0 = arith.constant 0 : i32
    %c0_i32_1 = arith.constant 0 : i32
    return %c0_i32, %c0_i32_0 : i32, i32
  }
  func.func @transform_12(%arg0: i32) -> (i32, i32) {
    %c0_i32 = arith.constant 0 : i32
    %c0_i32_0 = arith.constant 0 : i32
    %c0_i32_1 = arith.constant 0 : i32
    return %c0_i32, %c0_i32_0 : i32, i32
  }
  func.func @transform_13(%arg0: i32) -> (i32, i32) {
    %c0_i32 = arith.constant 0 : i32
    %c0_i32_0 = arith.constant 0 : i32
    return %c0_i32, %arg0 : i32, i32
  }
}

</mosaic_0001>

<bundles_post_ra>
// kernel: _lambda_.1
= control target key start
LH: loop header
LB: loop body
LE: loop exit
PB: predicated region body
PF: predicated region fallthrough
CT: control target
= control target key end

     0   :  { %18 = vsyncpa [#allocation3], 0  ;;  %s1741_s0 = inlined_call_operand.hbm [shape: f32[8,16], index: 0, kind: input, shape index: {}]   ;;  %s1742_s1 = inlined_call_operand.hbm [shape: f32[1,8], index: 1, kind: input, shape index: {}]   ;;  %s1743_s2 = inlined_call_operand.hbm [shape: f32[32,16], index: 2, kind: input, shape index: {}]   ;;  %s1744_s3 = inlined_call_operand.hbm [shape: f32[32,1], index: 3, kind: input, shape index: {}]   ;;  %s1745_s4 = inlined_call_operand.hbm [shape: f32[32,32], index: 4, kind: input, shape index: {}]   ;;  %s1746_s5 = inlined_call_operand.hbm [shape: f32[32,1], index: 5, kind: input, shape index: {}]   ;;  %s1747_s6 = inlined_call_operand.hbm [shape: f32[16,32], index: 6, kind: input, shape index: {}]   ;;  %s1748_s7 = inlined_call_operand.hbm [shape: f32[16,1], index: 7, kind: input, shape index: {}]   ;;  %s1749_s8 = inlined_call_operand.hbm [shape: f32[16,1], index: 8, kind: input, shape index: {}]   ;;  %s1750_s9 = inlined_call_operand.hbm [shape: f32[4,16], index: 9, kind: input, shape index: {}]   ;;  %s1751_s10 = inlined_call_operand.hbm [shape: f32[4,1], index: 10, kind: input, shape index: {}]   ;;  %s1752_s11 = inlined_call_operand.hbm [shape: f32[4,1], index: 11, kind: input, shape index: {}]   ;;  %s1753_s12 = inlined_call_operand.hbm [shape: f32[4,1], index: 12, kind: input, shape index: {}]   ;;  %s1754_s13 = inlined_call_operand.hbm [shape: f32[4,8], index: 13, kind: output, shape index: {}]  }
   0x1   :  { %19 = vsyncpa [#allocation6], 0 }
   0x2   :  { %20 = vsyncpa [#allocation9], 0 }
   0x3   :  { %21 = vsyncpa [#allocation12], 0 }
   0x4   :  { %22 = vsyncpa [#allocation15], 0 }
   0x5   :  { %23 = vsyncpa [#allocation18], 0 }
   0x6   :  { %24 = vsyncpa [#allocation21], 0 }
   0x7   :  { %25 = vsyncpa [#allocation4], 0 }
   0x8   :  { %30 = vsyncadd [#allocation3], 1920  ;;  %s1410_s25 = smov [#allocation5]   ;;  %s1086_s29 = scalar_lea.hbm %s1742_s1, 16 }
   0x9   :  { %s44_s26 = sshll.u32 %s1410_s25, 4  ;;  %p1087_p0 = scmp.ne.s32.totalorder %s1742_s1, %s1086_s29  ;;  %s45_s26 = int_to_ptr.vmem [resolvable:$true] %s44_s26 }
   0xa   :  { %p1090_p1 = scmp.lt.u32.totalorder %s1086_s29, %s1742_s1 }
   0xc   :  { %p1092_p2 = pnand %p1090_p1, %p1087_p0 }
   0xe   :  { %1095 = shalt.err (!%p1092_p2)
}
   0xf   :  { %s1096_s17 = scalar_lea.vmem %s45_s26, 16  ;;  %s1100_s18 = scalar_lea.vmem %s45_s26, 32 }
  0x10   :  { %p1097_p3 = scmp.ne.s32.totalorder %s45_s26, %s1096_s17  ;;  %p1101_p4 = scmp.lt.s32.totalorder %s45_s26, %s45_s26 }
  0x11   :  { %p1102_p5 = scmp.lt.s32.totalorder %s1100_s18, %s1096_s17 }
  0x13   :  { %p1103_p6 = por %p1102_p5, %p1101_p4 }
  0x15   :  { %p1104_p7 = pnand %p1103_p6, %p1097_p3 }
  0x17   :  { %1107 = shalt.err (!%p1104_p7)
}
  0x18   :  { %47 = dma.hbm_to_vmem [thread:$0]  %s1742_s1, 16, %s45_s26, [#allocation6]  }
  0x19   :  { %s1411_s21 = smov [#allocation8]   ;;  %s1412_s23 = smov [#allocation11]  }
  0x1a   :  { %s65_s22 = sshll.u32 %s1411_s21, 4  ;;  %s89_s24 = sshll.u32 %s1412_s23, 4  ;;  %s66_s22 = int_to_ptr.vmem [resolvable:$true] %s65_s22  ;;  %s90_s24 = int_to_ptr.vmem [resolvable:$true] %s89_s24 }
  0x1b   :  { %s1108_s28 = scalar_lea.hbm %s1744_s3, 512 }
  0x1c   :  { %p1109_p8 = scmp.ne.s32.totalorder %s1744_s3, %s1108_s28  ;;  %p1112_p9 = scmp.lt.u32.totalorder %s1108_s28, %s1744_s3 }
  0x1e   :  { %p1114_p10 = pnand %p1112_p9, %p1109_p8 }
  0x20   :  { %1117 = shalt.err (!%p1114_p10)
}
  0x21   :  { %s1118_s1 = scalar_lea.vmem %s66_s22, 512  ;;  %p1123_p12 = scmp.lt.s32.totalorder %s66_s22, %s66_s22 }
  0x22   :  { %p1119_p11 = scmp.ne.s32.totalorder %s66_s22, %s1118_s1  ;;  %p1124_p13 = scmp.lt.s32.totalorder %s1118_s1, %s1118_s1 }
  0x24   :  { %p1125_p0 = por %p1124_p13, %p1123_p12 }
  0x26   :  { %p1126_p1 = pnand %p1125_p0, %p1119_p11 }
  0x28   :  { %1129 = shalt.err (!%p1126_p1)
}
  0x29   :  { %s1413_s26 = smov 128   ;;  %s1414_s16 = smov 8  }
  0x2a   :  { %71 = dma.hbm_to_vmem [thread:$0]  %s1744_s3, 512, %s66_s22, [#allocation9], %s1413_s26, %s1413_s26, %s1414_s16  }
  0x2b   :  { %s1130_s21 = scalar_lea.hbm %s1746_s5, 512 }
  0x2c   :  { %p1131_p2 = scmp.ne.s32.totalorder %s1746_s5, %s1130_s21  ;;  %p1134_p3 = scmp.lt.u32.totalorder %s1130_s21, %s1746_s5 }
  0x2e   :  { %p1136_p4 = pnand %p1134_p3, %p1131_p2 }
  0x30   :  { %1139 = shalt.err (!%p1136_p4)
}
  0x31   :  { %s1140_s29 = scalar_lea.vmem %s90_s24, 512  ;;  %p1145_p6 = scmp.lt.s32.totalorder %s90_s24, %s90_s24 }
  0x32   :  { %p1141_p5 = scmp.ne.s32.totalorder %s90_s24, %s1140_s29  ;;  %p1146_p7 = scmp.lt.s32.totalorder %s1140_s29, %s1140_s29 }
  0x34   :  { %p1147_p8 = por %p1146_p7, %p1145_p6 }
  0x36   :  { %p1148_p9 = pnand %p1147_p8, %p1141_p5 }
  0x38   :  { %1151 = shalt.err (!%p1148_p9)
}
  0x39   :  { %95 = dma.hbm_to_vmem [thread:$0]  %s1746_s5, 512, %s90_s24, [#allocation12], %s1413_s26, %s1413_s26, %s1414_s16  }
  0x3a   :  { %s1415_s30 = smov [#allocation14]   ;;  %s1416_s15 = smov [#allocation17]  }
  0x3b   :  { %s113_s14 = sshll.u32 %s1415_s30, 4  ;;  %s138_s1 = sshll.u32 %s1416_s15, 4  ;;  %s114_s14 = int_to_ptr.vmem [resolvable:$true] %s113_s14  ;;  %s139_s1 = int_to_ptr.vmem [resolvable:$true] %s138_s1 }
  0x3c   :  { %s1152_s19 = scalar_lea.hbm %s1748_s7, 256 }
  0x3d   :  { %p1153_p10 = scmp.ne.s32.totalorder %s1748_s7, %s1152_s19  ;;  %p1156_p11 = scmp.lt.u32.totalorder %s1152_s19, %s1748_s7 }
  0x3f   :  { %p1158_p12 = pnand %p1156_p11, %p1153_p10 }
  0x41   :  { %1161 = shalt.err (!%p1158_p12)
}
  0x42   :  { %s1162_s5 = scalar_lea.vmem %s114_s14, 256  ;;  %p1167_p0 = scmp.lt.s32.totalorder %s114_s14, %s114_s14 }
  0x43   :  { %p1163_p13 = scmp.ne.s32.totalorder %s114_s14, %s1162_s5  ;;  %p1168_p1 = scmp.lt.s32.totalorder %s1162_s5, %s1162_s5 }
  0x45   :  { %p1169_p2 = por %p1168_p1, %p1167_p0 }
  0x47   :  { %p1170_p3 = pnand %p1169_p2, %p1163_p13 }
  0x49   :  { %1173 = shalt.err (!%p1170_p3)
}
  0x4a   :  { %119 = dma.hbm_to_vmem [thread:$0]  %s1748_s7, 256, %s114_s14, [#allocation15], %s1413_s26, %s1413_s26, %s1414_s16  }
  0x4b   :  { %s1174_s3 = scalar_lea.hbm %s1750_s9, 64 }
  0x4c   :  { %p1175_p4 = scmp.ne.s32.totalorder %s1750_s9, %s1174_s3  ;;  %p1178_p5 = scmp.lt.u32.totalorder %s1174_s3, %s1750_s9 }
  0x4e   :  { %p1180_p6 = pnand %p1178_p5, %p1175_p4 }
  0x50   :  { %1183 = shalt.err (!%p1180_p6)
}
  0x51   :  { %s1184_s18 = scalar_lea.vmem %s139_s1, 64  ;;  %p1189_p8 = scmp.lt.s32.totalorder %s139_s1, %s139_s1 }
  0x52   :  { %p1185_p7 = scmp.ne.s32.totalorder %s139_s1, %s1184_s18  ;;  %p1190_p9 = scmp.lt.s32.totalorder %s1184_s18, %s1184_s18 }
  0x54   :  { %p1191_p10 = por %p1190_p9, %p1189_p8 }
  0x56   :  { %p1192_p11 = pnand %p1191_p10, %p1185_p7 }
  0x58   :  { %1195 = shalt.err (!%p1192_p11)
}
  0x59   :  { %141 = dma.hbm_to_vmem [thread:$0]  %s1750_s9, 64, %s139_s1, [#allocation18]  }
  0x5a   :  { %s1417_s19 = smov [#allocation20]   ;;  %s1418_s21 = smov [#allocation2]  }
  0x5b   :  { %s158_s20 = sshll.u32 %s1417_s19, 4  ;;  %s31_s23 = sshll.u32 %s1418_s21, 4  ;;  %s159_s20 = int_to_ptr.vmem [resolvable:$true] %s158_s20  ;;  %s32_s23 = int_to_ptr.vmem [resolvable:$true] %s31_s23 }
  0x5c   :  { %s1196_s24 = scalar_lea.hbm %s1752_s11, 64 }
  0x5d   :  { %p1197_p12 = scmp.ne.s32.totalorder %s1752_s11, %s1196_s24  ;;  %p1200_p13 = scmp.lt.u32.totalorder %s1196_s24, %s1752_s11 }
  0x5f   :  { %p1202_p0 = pnand %p1200_p13, %p1197_p12 }
  0x61   :  { %1205 = shalt.err (!%p1202_p0)
}
  0x62   :  { %s1206_s9 = scalar_lea.vmem %s159_s20, 64  ;;  %p1211_p2 = scmp.lt.s32.totalorder %s159_s20, %s159_s20 }
  0x63   :  { %p1207_p1 = scmp.ne.s32.totalorder %s159_s20, %s1206_s9  ;;  %p1212_p3 = scmp.lt.s32.totalorder %s1206_s9, %s1206_s9 }
  0x65   :  { %p1213_p4 = por %p1212_p3, %p1211_p2 }
  0x67   :  { %p1214_p5 = pnand %p1213_p4, %p1207_p1 }
  0x69   :  { %1217 = shalt.err (!%p1214_p5)
}
  0x6a   :  { %161 = dma.hbm_to_vmem [thread:$0]  %s1752_s11, 64, %s159_s20, [#allocation21]  }
  0x6b   :  { %s1218_s17 = scalar_lea.hbm %s1741_s0, 128 }
  0x6c   :  { %p1219_p6 = scmp.ne.s32.totalorder %s1741_s0, %s1218_s17  ;;  %p1222_p7 = scmp.lt.u32.totalorder %s1218_s17, %s1741_s0 }
  0x6e   :  { %p1224_p8 = pnand %p1222_p7, %p1219_p6 }
  0x70   :  { %1227 = shalt.err (!%p1224_p8)
}
  0x71   :  { %s1228_s21 = scalar_lea.vmem %s32_s23, 128  ;;  %s1232_s25 = scalar_lea.vmem %s32_s23, 2048 }
  0x72   :  { %p1229_p9 = scmp.ne.s32.totalorder %s32_s23, %s1228_s21  ;;  %p1233_p10 = scmp.lt.s32.totalorder %s32_s23, %s32_s23 }
  0x73   :  { %p1234_p11 = scmp.lt.s32.totalorder %s1232_s25, %s1228_s21 }
  0x75   :  { %p1235_p12 = por %p1234_p11, %p1233_p10 }
  0x77   :  { %p1236_p13 = pnand %p1235_p12, %p1229_p9 }
  0x79   :  { %1239 = shalt.err (!%p1236_p13)
}
  0x7a   :  { %37 = dma.hbm_to_vmem [thread:$0]  %s1741_s0, 128, %s32_s23, [#allocation3], %s1413_s26, %s1413_s26, %s1414_s16  }
  0x7b   :  { %s1419_s5 = smov [#allocation7]   ;;  %s1420_s27 = smov [#allocation10]  }
  0x7c   :  { %s53_s24 = sshll.u32 %s1419_s5, 4  ;;  %s77_s28 = sshll.u32 %s1420_s27, 4  ;;  %s54_s24 = int_to_ptr.vmem [resolvable:$true] %s53_s24  ;;  %s78_s28 = int_to_ptr.vmem [resolvable:$true] %s77_s28 }
  0x7d   :  { %s1240_s9 = scalar_lea.hbm %s1743_s2, 512 }
  0x7e   :  { %p1241_p0 = scmp.ne.s32.totalorder %s1743_s2, %s1240_s9  ;;  %p1244_p1 = scmp.lt.u32.totalorder %s1240_s9, %s1743_s2 }
  0x80   :  { %p1246_p2 = pnand %p1244_p1, %p1241_p0 }
  0x82   :  { %1249 = shalt.err (!%p1246_p2)
}
  0x83   :  { %s1250_s0 = scalar_lea.vmem %s54_s24, 512  ;;  %p1255_p4 = scmp.lt.s32.totalorder %s54_s24, %s54_s24 }
  0x84   :  { %p1251_p3 = scmp.ne.s32.totalorder %s54_s24, %s1250_s0  ;;  %p1256_p5 = scmp.lt.s32.totalorder %s1250_s0, %s1250_s0 }
  0x86   :  { %p1257_p6 = por %p1256_p5, %p1255_p4 }
  0x88   :  { %p1258_p7 = pnand %p1257_p6, %p1251_p3 }
  0x8a   :  { %1261 = shalt.err (!%p1258_p7)
}
  0x8b   :  { %59 = dma.hbm_to_vmem [thread:$0]  %s1743_s2, 512, %s54_s24, [#allocation6], %s1413_s26, %s1413_s26, %s1414_s16  }
  0x8c   :  { %s1262_s14 = scalar_lea.hbm %s1745_s4, 512 }
  0x8d   :  { %p1263_p8 = scmp.ne.s32.totalorder %s1745_s4, %s1262_s14  ;;  %p1266_p9 = scmp.lt.u32.totalorder %s1262_s14, %s1745_s4 }
  0x8f   :  { %p1268_p10 = pnand %p1266_p9, %p1263_p8 }
  0x91   :  { %1271 = shalt.err (!%p1268_p10)
}
  0x92   :  { %s1272_s20 = scalar_lea.vmem %s78_s28, 512  ;;  %p1277_p12 = scmp.lt.s32.totalorder %s78_s28, %s78_s28 }
  0x93   :  { %p1273_p11 = scmp.ne.s32.totalorder %s78_s28, %s1272_s20  ;;  %p1278_p13 = scmp.lt.s32.totalorder %s1272_s20, %s1272_s20 }
  0x95   :  { %p1279_p0 = por %p1278_p13, %p1277_p12 }
  0x97   :  { %p1280_p1 = pnand %p1279_p0, %p1273_p11 }
  0x99   :  { %1283 = shalt.err (!%p1280_p1)
}
  0x9a   :  { %83 = dma.hbm_to_vmem [thread:$0]  %s1745_s4, 512, %s78_s28, [#allocation9], %s1413_s26, %s1413_s26, %s1414_s16  }
  0x9b   :  { %s1421_s24 = smov [#allocation13]   ;;  %s1422_s29 = smov [#allocation16]  }
  0x9c   :  { %s101_s27 = sshll.u32 %s1421_s24, 4  ;;  %s125_s3 = sshll.u32 %s1422_s29, 4  ;;  %s102_s27 = int_to_ptr.vmem [resolvable:$true] %s101_s27  ;;  %s126_s3 = int_to_ptr.vmem [resolvable:$true] %s125_s3 }
  0x9d   :  { %s1284_s22 = scalar_lea.hbm %s1747_s6, 256 }
  0x9e   :  { %p1285_p2 = scmp.ne.s32.totalorder %s1747_s6, %s1284_s22  ;;  %p1288_p3 = scmp.lt.u32.totalorder %s1284_s22, %s1747_s6 }
  0xa0   :  { %p1290_p4 = pnand %p1288_p3, %p1285_p2 }
  0xa2   :  { %1293 = shalt.err (!%p1290_p4)
}
  0xa3   :  { %s1294_s4 = scalar_lea.vmem %s102_s27, 256  ;;  %p1299_p6 = scmp.lt.s32.totalorder %s102_s27, %s102_s27 }
  0xa4   :  { %p1295_p5 = scmp.ne.s32.totalorder %s102_s27, %s1294_s4  ;;  %p1300_p7 = scmp.lt.s32.totalorder %s1294_s4, %s1294_s4 }
  0xa6   :  { %p1301_p8 = por %p1300_p7, %p1299_p6 }
  0xa8   :  { %p1302_p9 = pnand %p1301_p8, %p1295_p5 }
  0xaa   :  { %1305 = shalt.err (!%p1302_p9)
}
  0xab   :  { %107 = dma.hbm_to_vmem [thread:$0]  %s1747_s6, 256, %s102_s27, [#allocation12], %s1413_s26, %s1413_s26, %s1414_s16  }
  0xac   :  { %s1306_s14 = scalar_lea.hbm %s1749_s8, 256 }
  0xad   :  { %p1307_p10 = scmp.ne.s32.totalorder %s1749_s8, %s1306_s14  ;;  %p1310_p11 = scmp.lt.u32.totalorder %s1306_s14, %s1749_s8 }
  0xaf   :  { %p1312_p12 = pnand %p1310_p11, %p1307_p10 }
  0xb1   :  { %1315 = shalt.err (!%p1312_p12)
}
  0xb2   :  { %s1316_s20 = scalar_lea.vmem %s126_s3, 256  ;;  %p1321_p0 = scmp.lt.s32.totalorder %s126_s3, %s126_s3 }
  0xb3   :  { %p1317_p13 = scmp.ne.s32.totalorder %s126_s3, %s1316_s20  ;;  %p1322_p1 = scmp.lt.s32.totalorder %s1316_s20, %s1316_s20 }
  0xb5   :  { %p1323_p2 = por %p1322_p1, %p1321_p0 }
  0xb7   :  { %p1324_p3 = pnand %p1323_p2, %p1317_p13 }
  0xb9   :  { %1327 = shalt.err (!%p1324_p3)
}
  0xba   :  { %131 = dma.hbm_to_vmem [thread:$0]  %s1749_s8, 256, %s126_s3, [#allocation15], %s1413_s26, %s1413_s26, %s1414_s16  }
  0xbb   :  { %s1423_s5 = smov [#allocation19]   ;;  %s1424_s27 = smov [#allocation22]  }
  0xbc   :  { %s148_s24 = sshll.u32 %s1423_s5, 4  ;;  %s168_s29 = sshll.u32 %s1424_s27, 4  ;;  %s149_s24 = int_to_ptr.vmem [resolvable:$true] %s148_s24  ;;  %s169_s29 = int_to_ptr.vmem [resolvable:$true] %s168_s29 }
  0xbd   :  { %s1328_s22 = scalar_lea.hbm %s1751_s10, 64 }
  0xbe   :  { %p1329_p4 = scmp.ne.s32.totalorder %s1751_s10, %s1328_s22  ;;  %p1332_p5 = scmp.lt.u32.totalorder %s1328_s22, %s1751_s10 }
  0xc0   :  { %p1334_p6 = pnand %p1332_p5, %p1329_p4 }
  0xc2   :  { %1337 = shalt.err (!%p1334_p6)
}
  0xc3   :  { %s1338_s8 = scalar_lea.vmem %s149_s24, 64  ;;  %p1343_p8 = scmp.lt.s32.totalorder %s149_s24, %s149_s24 }
  0xc4   :  { %p1339_p7 = scmp.ne.s32.totalorder %s149_s24, %s1338_s8  ;;  %p1344_p9 = scmp.lt.s32.totalorder %s1338_s8, %s1338_s8 }
  0xc6   :  { %p1345_p10 = por %p1344_p9, %p1343_p8 }
  0xc8   :  { %p1346_p11 = pnand %p1345_p10, %p1339_p7 }
  0xca   :  { %1349 = shalt.err (!%p1346_p11)
}
  0xcb   :  { %151 = dma.hbm_to_vmem [thread:$0]  %s1751_s10, 64, %s149_s24, [#allocation18]  }
  0xcc   :  { %s1350_s28 = scalar_lea.hbm %s1753_s12, 64 }
  0xcd   :  { %p1351_p12 = scmp.ne.s32.totalorder %s1753_s12, %s1350_s28  ;;  %p1354_p13 = scmp.lt.u32.totalorder %s1350_s28, %s1753_s12 }
  0xcf   :  { %p1356_p0 = pnand %p1354_p13, %p1351_p12 }
  0xd1   :  { %1359 = shalt.err (!%p1356_p0)
}
  0xd2   :  { %s1360_s19 = scalar_lea.vmem %s169_s29, 64  ;;  %p1365_p2 = scmp.lt.s32.totalorder %s169_s29, %s169_s29 }
  0xd3   :  { %p1361_p1 = scmp.ne.s32.totalorder %s169_s29, %s1360_s19  ;;  %p1366_p3 = scmp.lt.s32.totalorder %s1360_s19, %s1360_s19 }
  0xd5   :  { %p1367_p4 = por %p1366_p3, %p1365_p2 }
  0xd7   :  { %p1368_p5 = pnand %p1367_p4, %p1361_p1 }
  0xd9   :  { %1371 = shalt.err (!%p1368_p5)
}
  0xda   :  { %171 = dma.hbm_to_vmem [thread:$0]  %s1753_s12, 64, %s169_s29, [#allocation21]  }
  0xdb   :  { %1394 = dma.done.wait [#allocation3], 2048  }
  0xdc   :  { %1395 = vsyncadd [#allocation3], 4294965248 }
  0xdd   :  { %1396 = dma.done.wait [#allocation6], 528  }
  0xde   :  { %1397 = vsyncadd [#allocation6], 4294966768 }
  0xdf   :  { %1398 = dma.done.wait [#allocation9], 1024  }
  0xe0   :  { %1399 = vsyncadd [#allocation9], 4294966272 }
  0xe1   :  { %1400 = dma.done.wait [#allocation12], 768  }
  0xe2   :  { %1401 = vsyncadd [#allocation12], 4294966528 }
  0xe3   :  { %1402 = dma.done.wait [#allocation15], 512  }
  0xe4   :  { %1403 = vsyncadd [#allocation15], 4294966784 }
  0xe5   :  { %1404 = dma.done.wait [#allocation18], 128  }
  0xe6   :  { %1405 = vsyncadd [#allocation18], 4294967168 }
  0xe7   :  { %1406 = dma.done.wait [#allocation21], 128  }
  0xe8   :  { %1407 = vsyncadd [#allocation21], 4294967168  ;;  %v1425_v0 = vmov 0   ;;  %vm256_vm0 = vcmask 130048   ;;  %v211_v2 = vld [vmem:[#allocation2] sm:$0xff]  ;;  %v212_v3 = vld [vmem:[#allocation2 + $0x8] sm:$0xff] }
  0xe9   :  { %1060 = vset.pattern.permute.xlu0 %v1425_v0  ;;  %1061 = vset.pattern.permute.xlu1 %v1425_v0  ;;  %vm1682_vm1 = vmpackc.low %vm256_vm0, %vm256_vm0  ;;  %v213_v4 = vld [vmem:[#allocation2 + $0x10] sm:$0xff]  ;;  %v973_v5 = vpack.c.bf16 %v212_v3, %v211_v2  ;;  %v214_v6 = vld [vmem:[#allocation2 + $0x18] sm:$0xff]  ;;  %vm454_vm2 = vcmask 261120   ;;  %vm1427_vm11 = vmmov 0   ;;  %s1429_s12 = smov [#allocation23]  }
  0xea   :  { %v979_v7 = vpack.c.bf16 %v214_v6, %v213_v4  ;;  %v228_v8 = vld [vmem:[#allocation7] sm:$0xff]  ;;  %v234_v12 = vld [vmem:[#allocation8 + $0x10] sm:$0xff]  ;;  %v233_v13 = vld [vmem:[#allocation8 + $0x8] sm:$0xff]  ;;  %s812_s25 = sshll.u32 %s1429_s12, 4  ;;  %s813_s25 = int_to_ptr.vmem [resolvable:$true] %s812_s25 }
  0xeb   :  { %975 = vmatprep.subr.msk.bf16.mxu0 %vm1682_vm1, %v973_v5  ;;  %v215_v9 = vld [vmem:[#allocation2 + $0x20] sm:$0xff]  ;;  %v216_v10 = vld [vmem:[#allocation2 + $0x28] sm:$0xff]  ;;  %935 = vmatprep.mubr.msk.f32.mxu0 %vm256_vm0, %v228_v8  ;;  %v217_v18 = vld [vmem:[#allocation2 + $0x30] sm:$0xff]  ;;  %s1372_s11 = scalar_lea.vmem %s813_s25, 64  ;;  %p1377_p7 = scmp.lt.s32.totalorder %s813_s25, %s813_s25 }
  0xec   :  { %978 = vmatpush3.bf16.xpose.msk.msra.mxu0 %vm1682_vm1, %v973_v5  ;;  %v232_v11 = vld [vmem:[#allocation8] sm:$0xff]  ;;  %248 = vperm.xlu1 %1061, %v234_v12   ;;  %v985_v14 = vpack.c.bf16 %v216_v10, %v215_v9  ;;  %v235_v15 = vld [vmem:[#allocation8 + $0x18] sm:$0xff]  ;;  %v431_v17 = vld [vmem:[#allocation11 + $0x8] sm:$0xff]  ;;  %p1373_p6 = scmp.ne.s32.totalorder %s813_s25, %s1372_s11  ;;  %p1378_p8 = scmp.lt.s32.totalorder %s1372_s11, %s1372_s11 }
  0xed   :  { %981 = vmatprep.subr.msk.bf16.mxu0 %vm1682_vm1, %v979_v7  ;;  %238 = vperm.xlu0 %1060, %v232_v11   ;;  %v430_v16 = vld [vmem:[#allocation11] sm:$0xff]  ;;  %v218_v19 = vld [vmem:[#allocation2 + $0x38] sm:$0xff]  ;;  %v680_v29 = vld [vmem:[#allocation16 + $0x8] sm:$0xff] }
  0xee   :  { %v432_v20 = vld [vmem:[#allocation11 + $0x10] sm:$0xff]  ;;  %v991_v21 = vpack.c.bf16 %v218_v19, %v217_v18  ;;  %v433_v22 = vld [vmem:[#allocation11 + $0x18] sm:$0xff]  ;;  %v220_v26 = vld [vmem:[#allocation2 + $0x48] sm:$0xff]  ;;  %p1379_p9 = por %p1378_p8, %p1377_p7 }
  0xef   :  { %v578_v23 = vld [vmem:[#allocation14] sm:$0xff]  ;;  %v579_v24 = vld [vmem:[#allocation14 + $0x8] sm:$0xff]  ;;  %v679_v27 = vld [vmem:[#allocation16] sm:$0xff] }
  0xf0   :  { %253 = vperm.xlu1 %1061, %v235_v15   ;;  %v219_v25 = vld [vmem:[#allocation2 + $0x40] sm:$0xff]  ;;  %v706_v30 = vld [vmem:[#allocation19] sm:$0xf]  ;;  %v785_v34 = vld [vmem:[#allocation20] sm:$0xf]  ;;  %p1380_p10 = pnand %p1379_p9, %p1373_p6 }
  0xf1   :  { %243 = vperm.xlu0 %1060, %v233_v13   ;;  %v997_v28 = vpack.c.bf16 %v220_v26, %v219_v25  ;;  %v792_v31 = vld [vmem:[#allocation22] sm:$0xf]  ;;  %v221_v32 = vld [vmem:[#allocation2 + $0x50] sm:$0xff]  ;;  %v224_v37 = vld [vmem:[#allocation2 + $0x68] sm:$0xff] }
  0xf2   :  { %v222_v33 = vld [vmem:[#allocation2 + $0x58] sm:$0xff]  ;;  %v223_v36 = vld [vmem:[#allocation2 + $0x60] sm:$0xff]  ;;  %v225_v39 = vld [vmem:[#allocation2 + $0x70] sm:$0xff] }
  0xf3   :  { %v1003_v35 = vpack.c.bf16 %v222_v33, %v221_v32  ;;  %v1009_v38 = vpack.c.bf16 %v224_v37, %v223_v36  ;;  %v226_v40 = vld [vmem:[#allocation2 + $0x78] sm:$0xff]  ;;  %v229_v42 = vld [vmem:[#allocation7 + $0x8] sm:$0xff]  ;;  %v426_v45 = vld [vmem:[#allocation10] sm:$0xff] }
  0xf4   :  { %984 = vmatpush3.bf16.xpose.msk.msra.mxu0 %vm1682_vm1, %v979_v7  ;;  %441 = vperm.xlu1 %1061, %v431_v17   ;;  %v1015_v41 = vpack.c.bf16 %v226_v40, %v225_v39  ;;  %v230_v43 = vld [vmem:[#allocation7 + $0x10] sm:$0xff]  ;;  %v231_v44 = vld [vmem:[#allocation7 + $0x18] sm:$0xff]  ;;  %v576_v19 = vld [vmem:[#allocation13] sm:$0xff] }
  0xf5   :  { %987 = vmatprep.subr.msk.bf16.mxu0 %vm1682_vm1, %v985_v14  ;;  %436 = vperm.xlu0 %1060, %v430_v16   ;;  %v427_v16 = vld [vmem:[#allocation10 + $0x8] sm:$0xff]  ;;  %v428_v17 = vld [vmem:[#allocation10 + $0x10] sm:$0xff]  ;;  %v429_v18 = vld [vmem:[#allocation10 + $0x18] sm:$0xff] }
  0xf6   :  { %949 = vmatprep.mubr.msk.f32.mxu1 %vm454_vm2, %v426_v45 }
  0xf8   :  { %451 = vperm.xlu1 %1061, %v433_v22  }
  0xf9   :  { %446 = vperm.xlu0 %1060, %v432_v20  }
  0xfc   :  { %990 = vmatpush3.bf16.xpose.msk.msra.mxu0 %vm1682_vm1, %v985_v14  ;;  %587 = vperm.xlu1 %1061, %v579_v24  }
  0xfd   :  { %993 = vmatprep.subr.msk.bf16.mxu0 %vm1682_vm1, %v991_v21  ;;  %582 = vperm.xlu0 %1060, %v578_v23  }
 0x100   :  { %688 = vperm.xlu1 %1061, %v680_v29  }
 0x101   :  { %683 = vperm.xlu0 %1060, %v679_v27  }
 0x104   :  { %996 = vmatpush3.bf16.xpose.msk.msra.mxu0 %vm1682_vm1, %v991_v21  ;;  %795 = vperm.xlu1 %1061, %v792_v31  }
 0x105   :  { %999 = vmatprep.subr.msk.bf16.mxu0 %vm1682_vm1, %v997_v28  ;;  %709 = vperm.xlu0 %1060, %v706_v30  }
 0x109   :  { %801 = vperm.xlu0 %1060, %v785_v34  }
 0x10c   :  { %1002 = vmatpush3.bf16.xpose.msk.msra.mxu0 %vm1682_vm1, %v997_v28 }
 0x10d   :  { %1005 = vmatprep.subr.msk.bf16.mxu0 %vm1682_vm1, %v1003_v35 }
 0x114   :  { %1008 = vmatpush3.bf16.xpose.msk.msra.mxu0 %vm1682_vm1, %v1003_v35 }
 0x115   :  { %1011 = vmatprep.subr.msk.bf16.mxu0 %vm1682_vm1, %v1009_v38 }
 0x11c   :  { %1014 = vmatpush3.bf16.xpose.msk.msra.mxu0 %vm1682_vm1, %v1009_v38 }
 0x11d   :  { %1017 = vmatprep.subr.msk.bf16.mxu0 %vm1682_vm1, %v1015_v41 }
 0x124   :  { %1020 = vmatpush3.bf16.xpose.msk.msra.mxu0 %vm1682_vm1, %v1015_v41 }
 0x12b   :  { %936 = vmatmul.mubr.msk.f32.vlgmr.msra.gmra.mrb[0].mxu0 %vm256_vm0, %v229_v42 }
 0x12c   :  { %938 = vmatprep.mubr.msk.f32.mxu0 %vm256_vm0, %v230_v43 }
 0x12f   :  { %939 = vmatmul.mubr.msk.f32.gmra.mrb[2].mxu0 %vm256_vm0, %v231_v44 }
 0x16b   :  { %v249_v47 = vpop.permute.xlu1 %248 }
 0x16c   :  { %v239_v46 = vpop.permute.xlu0 %238 }
 0x16f   :  { %v254_v54 = vpop.permute.xlu1 %253 }
 0x170   :  { %v244_v48 = vpop.permute.xlu0 %243 }
 0x173   :  { %v442_v20 = vpop.permute.xlu1 %441 }
 0x174   :  { %v437_v21 = vpop.permute.xlu0 %436 }
 0x177   :  { %v452_v27 = vpop.permute.xlu1 %451 }
 0x178   :  { %v447_v30 = vpop.permute.xlu0 %446 }
 0x1fe   :  { %v937_v49 = vpop.f32.mrb[0].mxu0 }
 0x1ff   :  { %v389_v50 = vadd.f32 %v937_v49, %v244_v48  ;;  %v383_v51 = vpop.f32.mrb[1].mxu0 }
 0x200   :  { %v384_v52 = vadd.f32 %v383_v51, %v239_v46 }
 0x201   :  { %v407_v53 = vmin.f32 %v389_v50, 0.0  ;;  %vm403_vm3 = vcmp.gt.f32.partialorder %v389_v50, 0.0 }
 0x202   :  { %v406_v55 = vmin.f32 %v384_v52, 0.0  ;;  %v940_v56 = vpop.f32.mrb[2].mxu0  ;;  %vm402_vm4 = vcmp.gt.f32.partialorder %v384_v52, 0.0 }
 0x203   :  { %v412_v57 = vmul.f32 1.442695, %v407_v53  ;;  %v399_v58 = vadd.f32 %v940_v56, %v254_v54  ;;  %v393_v59 = vpop.f32.mrb[3].mxu0  ;;  %v577_v54 = vld [vmem:[#allocation13 + $0x8] sm:$0xff]  ;;  %v1428_v56 = vmov 0.0  }
 0x204   :  { %v410_v60 = vmul.f32 1.442695, %v406_v55  ;;  %v394_v61 = vadd.f32 %v393_v59, %v249_v47  ;;  %v1426_v55 = vmov 0.0|0.0   ;;  %v859_v59 = vld [vmem:[#allocation5] ss:$0 sm:$0xff] }
 0x205   :  { %1062 = vpow2.f32 %v412_v57  ;;  %v409_v62 = vmin.f32 %v399_v58, 0.0  ;;  %vm405_vm5 = vcmp.gt.f32.partialorder %v399_v58, 0.0  ;;  %v588_v57 = vpop.permute.xlu1 %587 }
 0x206   :  { %1064 = vpow2.f32 %v410_v60  ;;  %v408_v63 = vmin.f32 %v394_v61, 0.0  ;;  %vm404_vm6 = vcmp.gt.f32.partialorder %v394_v61, 0.0  ;;  %v597_v60 = vmul.f32 %v859_v59, %v588_v57 }
 0x207   :  { %v416_v0 = vmul.f32 1.442695, %v409_v62 }
 0x208   :  { %v414_v1 = vmul.f32 1.442695, %v408_v63 }
 0x209   :  { %1066 = vpow2.f32 %v416_v0 }
 0x20a   :  { %1068 = vpow2.f32 %v414_v1  ;;  %v689_v1 = vpop.permute.xlu1 %688 }
 0x20f   :  { %v1063_v2 = vpop.eup %1062 }
 0x210   :  { %v1065_v3 = vpop.eup %1064  ;;  %v848_v4 = vadd.f32 -1.0, %v1063_v2 }
 0x211   :  { %v847_v5 = vadd.f32 -1.0, %v1065_v3 }
 0x212   :  { %v423_v6 = vsel %vm403_vm3, %v389_v50, %v848_v4 }
 0x213   :  { %v1067_v7 = vpop.eup %1066  ;;  %v422_v8 = vsel %vm402_vm4, %v384_v52, %v847_v5 }
 0x214   :  { %v1069_v9 = vpop.eup %1068  ;;  %v850_v10 = vadd.f32 -1.0, %v1067_v7  ;;  %v1021_v11 = vpack.c.bf16 %v423_v6, %v422_v8 }
 0x215   :  { %v849_v12 = vadd.f32 -1.0, %v1069_v9 }
 0x216   :  { %1022 = vmatprep.subr.bf16.mxu1 %v1021_v11  ;;  %v425_v13 = vsel %vm405_vm5, %v399_v58, %v850_v10  ;;  %v583_v58 = vpop.permute.xlu0 %582 }
 0x217   :  { %1024 = vmatpush3.bf16.msra.mxu1 %v1021_v11  ;;  %v424_v14 = vsel %vm404_vm6, %v394_v61, %v849_v12  ;;  %v596_v61 = vmul.f32 %v859_v59, %v583_v58 }
 0x218   :  { %v1025_v15 = vpack.c.bf16 %v425_v13, %v424_v14 }
 0x21a   :  { %1026 = vmatprep.subr.bf16.mxu1 %v1025_v15  ;;  %v684_v3 = vpop.permute.xlu0 %683 }
 0x21b   :  { %1028 = vmatpush3.bf16.msra.mxu1 %v1025_v15 }
 0x21e   :  { %950 = vmatmul.mubr.msk.f32.vlgmr.msra.gmra.mrb[0].mxu1 %vm454_vm2, %v427_v16 }
 0x21f   :  { %952 = vmatprep.mubr.msk.f32.mxu1 %vm454_vm2, %v428_v17  ;;  %v705_v17 = vld [vmem:[#allocation17] sm:$0xf] }
 0x222   :  { %953 = vmatmul.mubr.msk.f32.gmra.mrb[2].mxu1 %vm454_vm2, %v429_v18  ;;  %v710_v18 = vpop.permute.xlu0 %709 }
 0x223   :  { %963 = vmatprep.mubr.msk.f32.mxu1 %vm454_vm2, %v576_v19 }
 0x2f1   :  { %v951_v22 = vpop.f32.mrb[0].mxu1 }
 0x2f2   :  { %v539_v23 = vadd.f32 %v951_v22, %v442_v20  ;;  %v533_v24 = vpop.f32.mrb[1].mxu1 }
 0x2f3   :  { %v534_v25 = vadd.f32 %v533_v24, %v437_v21 }
 0x2f4   :  { %v557_v26 = vmin.f32 %v539_v23, 0.0  ;;  %vm553_vm7 = vcmp.gt.f32.partialorder %v539_v23, 0.0 }
 0x2f5   :  { %v556_v28 = vmin.f32 %v534_v25, 0.0  ;;  %v954_v29 = vpop.f32.mrb[2].mxu1  ;;  %vm552_vm8 = vcmp.gt.f32.partialorder %v534_v25, 0.0 }
 0x2f6   :  { %v562_v31 = vmul.f32 1.442695, %v557_v26  ;;  %v549_v32 = vadd.f32 %v954_v29, %v452_v27  ;;  %v543_v33 = vpop.f32.mrb[3].mxu1  ;;  %v796_v26 = vpop.permute.xlu1 %795 }
 0x2f7   :  { %v560_v34 = vmul.f32 1.442695, %v556_v28  ;;  %v544_v35 = vadd.f32 %v543_v33, %v447_v30  ;;  %v802_v28 = vpop.permute.xlu0 %801 }
 0x2f8   :  { %1070 = vpow2.f32 %v562_v31  ;;  %v559_v36 = vmin.f32 %v549_v32, 0.0  ;;  %vm555_vm9 = vcmp.gt.f32.partialorder %v549_v32, 0.0 }
 0x2f9   :  { %1072 = vpow2.f32 %v560_v34  ;;  %v558_v37 = vmin.f32 %v544_v35, 0.0  ;;  %vm554_vm10 = vcmp.gt.f32.partialorder %v544_v35, 0.0 }
 0x2fa   :  { %v566_v38 = vmul.f32 1.442695, %v559_v36 }
 0x2fb   :  { %v564_v39 = vmul.f32 1.442695, %v558_v37 }
 0x2fc   :  { %1074 = vpow2.f32 %v566_v38 }
 0x2fd   :  { %1076 = vpow2.f32 %v564_v39 }
 0x302   :  { %v1071_v40 = vpop.eup %1070 }
 0x303   :  { %v1073_v41 = vpop.eup %1072  ;;  %v856_v42 = vadd.f32 -1.0, %v1071_v40 }
 0x304   :  { %v855_v43 = vadd.f32 -1.0, %v1073_v41 }
 0x305   :  { %v573_v44 = vsel %vm553_vm7, %v539_v23, %v856_v42 }
 0x306   :  { %v1075_v45 = vpop.eup %1074  ;;  %v572_v46 = vsel %vm552_vm8, %v534_v25, %v855_v43 }
 0x307   :  { %v1077_v47 = vpop.eup %1076  ;;  %v858_v48 = vadd.f32 -1.0, %v1075_v45  ;;  %v1029_v49 = vpack.c.bf16 %v573_v44, %v572_v46 }
 0x308   :  { %v857_v50 = vadd.f32 -1.0, %v1077_v47 }
 0x309   :  { %1030 = vmatprep.subr.bf16.mxu1 %v1029_v49  ;;  %v575_v51 = vsel %vm555_vm9, %v549_v32, %v858_v48 }
 0x30a   :  { %1032 = vmatpush3.bf16.msra.mxu1 %v1029_v49  ;;  %v574_v52 = vsel %vm554_vm10, %v544_v35, %v857_v50 }
 0x30b   :  { %v1033_v53 = vpack.c.bf16 %v575_v51, %v574_v52 }
 0x30d   :  { %1034 = vmatprep.subr.bf16.mxu1 %v1033_v53 }
 0x30e   :  { %1036 = vmatpush3.bf16.msra.mxu1 %v1033_v53 }
 0x30f   :  { %1037 = vmatprep.subr.bf16.mxu1 %v1426_v55 }
 0x311   :  { %964 = vmatmul.mubr.msk.f32.vlgmr.msra.gmra.mrb[4].mxu1 %vm454_vm2, %v577_v54 }
 0x312   :  { %970 = vmatprep.mubr.msk.f32.mxu1 %vm1427_vm11, %v1428_v56 }
 0x3e4   :  { %v965_v62 = vpop.f32.mrb[4].mxu1 }
 0x3e5   :  { %v676_v63 = vadd.f32 %v965_v62, %v597_v60  ;;  %v670_v0 = vpop.f32.mrb[5].mxu1 }
 0x3e6   :  { %v671_v2 = vadd.f32 %v670_v0, %v596_v61 }
 0x3e7   :  { %v692_v4 = vadd.f32 %v689_v1, %v676_v63 }
 0x3e8   :  { %v691_v5 = vadd.f32 %v684_v3, %v671_v2 }
 0x3e9   :  { %v696_v6 = vmin.f32 %v692_v4, 0.0  ;;  %vm694_vm12 = vcmp.gt.f32.partialorder %v692_v4, 0.0 }
 0x3ea   :  { %v695_v7 = vmin.f32 %v691_v5, 0.0  ;;  %vm693_vm13 = vcmp.gt.f32.partialorder %v691_v5, 0.0 }
 0x3eb   :  { %v699_v8 = vmul.f32 1.442695, %v696_v6 }
 0x3ec   :  { %v697_v9 = vmul.f32 1.442695, %v695_v7 }
 0x3ed   :  { %1078 = vpow2.f32 %v699_v8 }
 0x3ee   :  { %1080 = vpow2.f32 %v697_v9 }
 0x3f7   :  { %v1079_v10 = vpop.eup %1078 }
 0x3f8   :  { %v1081_v11 = vpop.eup %1080  ;;  %v863_v12 = vadd.f32 -1.0, %v1079_v10 }
 0x3f9   :  { %v862_v13 = vadd.f32 -1.0, %v1081_v11 }
 0x3fa   :  { %v704_v14 = vsel %vm694_vm12, %v692_v4, %v863_v12 }
 0x3fb   :  { %v703_v15 = vsel %vm693_vm13, %v691_v5, %v862_v13 }
 0x3fc   :  { %v1038_v16 = vpack.c.bf16 %v704_v14, %v703_v15 }
 0x3fe   :  { %1039 = vmatpush3.bf16.msra.mxu1 %v1038_v16 }
 0x401   :  { %971 = vmatmul.mubr.msk.f32.vlgmr.msra.gmra.mrb[6].mxu1 %vm256_vm0, %v705_v17 }
 0x4d4   :  { %v781_v19 = vpop.f32.mrb[6].mxu1 }
 0x4d5   :  { %v782_v20 = vadd.f32 %v781_v19, %v710_v18  ;;  %v972_v21 = vpop.f32.mrb[7].mxu1 }
 0x4d7   :  { %v865_v22 = vmul.f32 -1.442695, %v782_v20 }
 0x4d9   :  { %1082 = vpow2.f32 %v865_v22 }
 0x4e3   :  { %v1083_v23 = vpop.eup %1082 }
 0x4e4   :  { %v789_v24 = vadd.f32 1.0, %v1083_v23 }
 0x4e6   :  { %1084 = vrcp.f32 %v789_v24 }
 0x4f0   :  { %v1085_v25 = vpop.eup %1084 }
 0x4f1   :  { %v798_v27 = vmul.f32 %v1085_v25, %v796_v26 }
 0x4f3   :  { %v804_v29 = vadd.f32 %v802_v28, %v798_v27 }
 0x4f5   :  { %805 = vst [vmem:[#allocation23] sm:$0xf] %v804_v29 }
 0x4f6   :  { %1383 = shalt.err (!%p1380_p10)
}
 0x4f7   :  { %s1384_s2 = scalar_lea.hbm %s1754_s13, 64 }
 0x4f8   :  { %p1385_p11 = scmp.ne.s32.totalorder %s1754_s13, %s1384_s2  ;;  %p1388_p12 = scmp.lt.u32.totalorder %s1384_s2, %s1754_s13 }
 0x4fa   :  { %p1390_p13 = pnand %p1388_p12, %p1385_p11 }
 0x4fc   :  { %1393 = shalt.err (!%p1390_p13)
}
 0x4fd   :  { %815 = dma.vmem_to_hbm [thread:$0]  %s813_s25, 64, %s1754_s13, [#allocation4]  }
 0x4fe   :  { %1408 = dma.done.wait [#allocation4], 64  }
 0x4ff   :  { %1409 = vsyncadd [#allocation4], 4294967232 }
 0x500   :  { %819 = vsyncpa [#allocation3], 1 }
 0x501   :  { %820 = vsyncpa [#allocation6], 1 }
 0x502   :  { %821 = vsyncpa [#allocation9], 1 }
 0x503   :  { %822 = vsyncpa [#allocation12], 1 }
 0x504   :  { %823 = vsyncpa [#allocation15], 1 }
 0x505   :  { %824 = vsyncpa [#allocation18], 1 }
 0x506   :  { %825 = vsyncpa [#allocation21], 1 }
 0x507   :  { %826 = vsyncpa [#allocation4], 1 }

</bundles_post_ra>
